<compile_context>
chip_gen: v7x
topology: tpu7x:2x2x1
jax: 0.10.0
libtpu: 0.0.40
codegen_flags: <defaults>
</compile_context>

<pallas_src>
import functools
import numpy as np
import jax
import jax.numpy as jnp
from jax import lax
from jax.experimental import pallas as pl
from jax.experimental.pallas import tpu as pltpu


def _lstm_recurrent_kernel(chunk_t, hidden_size, unroll,
                           gx_ref, w_hh_ref, b_ref, out_ref, h_scr, c_scr):
    """Serial LSTM recurrence over one (batch-tile, time-chunk) block.

    gx_ref  : (chunk_t, TB, 4H) bf16  precomputed x @ W_ih^T, time-major
    w_hh_ref: (H, 4H)           bf16  recurrent weight (transposed), Buffered(1)
    b_ref   : (1, 4H)           f32   b_ih + b_hh, Buffered(1)
    out_ref : (chunk_t, TB, H)  bf16  hidden states h_t, time-major
    h_scr   : (TB, H)           bf16  state carried across time chunks
    c_scr   : (TB, H)           f32   state carried across time chunks
    """
    H = hidden_size

    # Reset state at the first time chunk of every batch block (time axis is
    # the innermost, sequential "arbitrary" grid axis).
    @pl.when(pl.program_id(1) == 0)
    def _():
        h_scr[...] = jnp.zeros_like(h_scr)
        c_scr[...] = jnp.zeros_like(c_scr)

    w_hh = w_hh_ref[...]                      # (H, 4H) bf16, VMEM-resident
    bias = b_ref[...]                         # (1, 4H) f32, broadcasts over TB

    def step(t, carry):
        h_bf, c = carry                       # (TB, H) bf16, (TB, H) f32
        # One recurrent matmul on the MXU (bf16 operands, f32 accumulation);
        # gate math stays f32 on the VPU/EUP.
        gates = (gx_ref[t].astype(jnp.float32) + bias
                 + jnp.dot(h_bf, w_hh, preferred_element_type=jnp.float32))
        i_g = jax.nn.sigmoid(gates[:, 0 * H:1 * H])
        f_g = jax.nn.sigmoid(gates[:, 1 * H:2 * H])
        g_g = jnp.tanh(gates[:, 2 * H:3 * H])
        o_g = jax.nn.sigmoid(gates[:, 3 * H:4 * H])
        c_new = f_g * c + i_g * g_g
        # Single cast to bf16 serves both the output store and next step's dot.
        h_new = (o_g * jnp.tanh(c_new)).astype(jnp.bfloat16)
        out_ref[t] = h_new
        return h_new, c_new

    h_fin, c_fin = lax.fori_loop(0, chunk_t, step,
                                 (h_scr[...], c_scr[...]), unroll=unroll)
    h_scr[...] = h_fin
    c_scr[...] = c_fin


def _pick_batch_tile(B):
    """Split batch into 2 sublane-aligned blocks (feeds both v7x TCs) when
    possible; otherwise keep the batch whole (block == full dim is legal)."""
    if B % 16 == 0:
        return B // 2
    return B


def _pick_chunk_t(T, tb, H, budget_bytes=12 * 1024 * 1024):
    """Largest time chunk whose double-buffered gx/out blocks + weight + bias
    + scratch fit the VMEM budget (conservative: fits v5e's 16 MiB scoped
    default and v7x's 64 MiB physical with room to spare)."""
    per_t = 2 * (tb * 4 * H * 2) + 2 * (tb * H * 2)     # gx + out, bf16, x2 buf
    fixed = (H * 4 * H * 2) + (4 * H * 4) + tb * H * (2 + 4)
    avail = max(budget_bytes - fixed, per_t)
    return int(max(1, min(avail // per_t, 64, T)))


def lstm_block_forward(x, params, hidden_size, num_layers):
    """x: (B, T, input_size) batch_first; returns (B, T, hidden_size)."""
    B, T, _ = x.shape
    H = hidden_size

    tb = _pick_batch_tile(B)
    n_b = B // tb
    chunk_t = _pick_chunk_t(T, tb, H)
    t_pad = ((T + chunk_t - 1) // chunk_t) * chunk_t
    n_chunks = t_pad // chunk_t
    unroll = int(min(8, chunk_t))

    recur = functools.partial(_lstm_recurrent_kernel, chunk_t, H, unroll)

    seq = None  # time-major bf16 hidden sequence of previous layer, (t_pad, B, H)
    for l in range(num_layers):
        w_ih, w_hh, b_ih, b_hh = params[l]      # (4H,in_l),(4H,H),(4H,),(4H,)
        w_ih_bf = w_ih.astype(jnp.bfloat16)
        w_hh_t_bf = jnp.transpose(w_hh).astype(jnp.bfloat16)        # (H, 4H)
        bias = (b_ih + b_hh).astype(jnp.float32).reshape(1, 4 * H)  # (1, 4H)

        # Hoisted input projection: one big bf16 matmul over all timesteps,
        # f32 accumulation, produced directly time-major, stored bf16 (halves
        # the dominant HBM stream into the kernel).
        if l == 0:
            gates_x = jnp.einsum(
                "bti,gi->tbg", x.astype(jnp.bfloat16), w_ih_bf,
                preferred_element_type=jnp.float32).astype(jnp.bfloat16)
            if t_pad != T:  # remainder chunk: pad time; padded steps are unused
                gates_x = jnp.pad(gates_x, ((0, t_pad - T), (0, 0), (0, 0)))
        else:
            gates_x = jnp.einsum(
                "tbh,gh->tbg", seq, w_ih_bf,
                preferred_element_type=jnp.float32).astype(jnp.bfloat16)

        seq = pl.pallas_call(
            recur,
            out_shape=jax.ShapeDtypeStruct((t_pad, B, H), jnp.bfloat16),
            grid=(n_b, n_chunks),
            in_specs=[
                pl.BlockSpec((chunk_t, tb, 4 * H), lambda b, t: (t, b, 0)),
                # Constant index_map -> W_hh / bias stay VMEM resident; single
                # buffer (no point double-buffering an invariant block).
                pl.BlockSpec((H, 4 * H), lambda b, t: (0, 0),
                             pipeline_mode=pl.Buffered(1)),
                pl.BlockSpec((1, 4 * H), lambda b, t: (0, 0),
                             pipeline_mode=pl.Buffered(1)),
            ],
            out_specs=pl.BlockSpec((chunk_t, tb, H), lambda b, t: (t, b, 0)),
            scratch_shapes=[pltpu.VMEM((tb, H), jnp.bfloat16),   # h
                            pltpu.VMEM((tb, H), jnp.float32)],   # c
            compiler_params=pltpu.CompilerParams(
                dimension_semantics=("parallel", "arbitrary"),
                vmem_limit_bytes=32 * 1024 * 1024),
        )(gates_x, w_hh_t_bf, bias)

    out = jnp.transpose(seq, (1, 0, 2))[:, :T, :]                # (B, T, H)
    return out.astype(x.dtype)


def lstm_ref(x, params, H, L):
    """Pure-JAX f32 reference with torch.nn.LSTM inference semantics."""
    B, T, _ = x.shape
    h = jnp.zeros((L, B, H), jnp.float32)
    c = jnp.zeros((L, B, H), jnp.float32)
    outs = []
    for t in range(T):
        inp = x[:, t, :].astype(jnp.float32)
        new_h, new_c = [], []
        for l in range(L):
            w_ih, w_hh, b_ih, b_hh = params[l]
            gates = inp @ w_ih.T + h[l] @ w_hh.T + b_ih + b_hh
            i = jax.nn.sigmoid(gates[:, :H])
            f = jax.nn.sigmoid(gates[:, H:2 * H])
            g = jnp.tanh(gates[:, 2 * H:3 * H])
            o = jax.nn.sigmoid(gates[:, 3 * H:])
            cc = f * c[l] + i * g
            hh = o * jnp.tanh(cc)
            new_h.append(hh)
            new_c.append(cc)
            inp = hh
        h = jnp.stack(new_h)
        c = jnp.stack(new_c)
        outs.append(inp)
    return jnp.stack(outs, axis=1)


if __name__ == "__main__":
    B, T, I, H, L = 2, 8, 16, 32, 3

    key = jax.random.PRNGKey(0)
    key, xk = jax.random.split(key)
    x = jax.random.normal(xk, (B, T, I), jnp.float32)

    # Deterministic parameter init mimicking nn.LSTM's U(-1/sqrt(H), 1/sqrt(H)).
    bound = 1.0 / np.sqrt(H)
    params = []
    for l in range(L):
        in_l = I if l == 0 else H
        key, k1, k2, k3, k4 = jax.random.split(key, 5)
        params.append((
            jax.random.uniform(k1, (4 * H, in_l), jnp.float32, -bound, bound),
            jax.random.uniform(k2, (4 * H, H), jnp.float32, -bound, bound),
            jax.random.uniform(k3, (4 * H,), jnp.float32, -bound, bound),
            jax.random.uniform(k4, (4 * H,), jnp.float32, -bound, bound),
        ))

    fwd = jax.jit(functools.partial(lstm_block_forward,
                                    hidden_size=H, num_layers=L))
    out = fwd(x, params)
    out = jax.block_until_ready(out)
    assert out.shape == (B, T, H)

    ref = lstm_ref(x, params, H, L)
    # Loose tolerance: matmul operands, gates_x stream, carried h and the
    # layer-to-layer activations are bf16 (f32 accumulation / gate math),
    # while the reference runs end-to-end in f32.
    np.testing.assert_allclose(np.asarray(out, dtype=np.float32),
                               np.asarray(ref), rtol=5e-2, atol=5e-2)
    print("KERNEL_OK")
</pallas_src>

<mosaic_0001>
module attributes {stable_mosaic.version = 11 : i64} {
  func.func @_lstm_recurrent_kernel(%arg0: i32, %arg1: i32, %arg2: memref<8x2x128xbf16, #tpu.memory_space<vmem>>, %arg3: memref<32x128xbf16, #tpu.memory_space<vmem>>, %arg4: memref<1x128xf32, #tpu.memory_space<vmem>>, %arg5: memref<8x2x32xbf16, #tpu.memory_space<vmem>>, %arg6: memref<2x32xbf16, #tpu.memory_space<vmem>>, %arg7: memref<2x32xf32, #tpu.memory_space<vmem>>) attributes {dimension_semantics = [#tpu.dimension_semantics<parallel>, #tpu.dimension_semantics<arbitrary>], iteration_bounds = array<i64: 1, 1>, scalar_prefetch = 0 : i64, scratch_operands = 2 : i64, tpu.core_type = #tpu.core_type<tc>, window_params = [{transform_indices = @transform_0, window_bounds = array<i64: 8, 2, 128>}, {pipeline_mode = #tpu.pipeline_mode<synchronous>, transform_indices = @transform_1, window_bounds = array<i64: 32, 128>}, {pipeline_mode = #tpu.pipeline_mode<synchronous>, transform_indices = @transform_2, window_bounds = array<i64: 1, 128>}, {transform_indices = @transform_3, window_bounds = array<i64: 8, 2, 32>}]} {
    %c0_i32 = arith.constant 0 : i32
    %0 = arith.cmpi eq, %arg1, %c0_i32 : i32
    %1 = arith.extui %0 : i1 to i32
    %c0_i32_0 = arith.constant 0 : i32
    %2 = arith.cmpi ne, %1, %c0_i32_0 : i32
    scf.if %2 {
      %cst_76 = arith.constant 0.000000e+00 : bf16
      %313 = vector.broadcast %cst_76 : bf16 to vector<2x32xbf16>
      %c0_77 = arith.constant 0 : index
      %c0_78 = arith.constant 0 : index
      %314 = vector.load %arg6[%c0_77, %c0_78] : memref<2x32xbf16, #tpu.memory_space<vmem>>, vector<2x32xbf16>
      tpu.vector_store %arg6[%c0_77, %c0_78], %313 {strides = array<i32>} : memref<2x32xbf16, #tpu.memory_space<vmem>>, vector<2x32xbf16>,
      %cst_79 = arith.constant 0.000000e+00 : f32
      %315 = vector.broadcast %cst_79 : f32 to vector<2x32xf32>
      %c0_80 = arith.constant 0 : index
      %c0_81 = arith.constant 0 : index
      %316 = vector.load %arg7[%c0_80, %c0_81] : memref<2x32xf32, #tpu.memory_space<vmem>>, vector<2x32xf32>
      tpu.vector_store %arg7[%c0_80, %c0_81], %315 {strides = array<i32>} : memref<2x32xf32, #tpu.memory_space<vmem>>, vector<2x32xf32>,
    } else {
    }
    %c0 = arith.constant 0 : index
    %c0_1 = arith.constant 0 : index
    %3 = vector.load %arg3[%c0, %c0_1] : memref<32x128xbf16, #tpu.memory_space<vmem>>, vector<32x128xbf16>
    %c0_2 = arith.constant 0 : index
    %c0_3 = arith.constant 0 : index
    %4 = vector.load %arg4[%c0_2, %c0_3] : memref<1x128xf32, #tpu.memory_space<vmem>>, vector<1x128xf32>
    %c0_4 = arith.constant 0 : index
    %c0_5 = arith.constant 0 : index
    %5 = vector.load %arg6[%c0_4, %c0_5] : memref<2x32xbf16, #tpu.memory_space<vmem>>, vector<2x32xbf16>
    %c0_6 = arith.constant 0 : index
    %c0_7 = arith.constant 0 : index
    %6 = vector.load %arg7[%c0_6, %c0_7] : memref<2x32xf32, #tpu.memory_space<vmem>>, vector<2x32xf32>
    %c0_i32_8 = arith.constant 0 : i32
    %7 = arith.index_cast %c0_i32_8 : i32 to index
    %c0_9 = arith.constant 0 : index
    %c0_10 = arith.constant 0 : index
    %8 = vector.load %arg2[%7, %c0_9, %c0_10] : memref<8x2x128xbf16, #tpu.memory_space<vmem>>, vector<1x2x128xbf16>
    %9 = vector.shape_cast %8 : vector<1x2x128xbf16> to vector<2x128xbf16>
    %10 = arith.extf %9 : vector<2x128xbf16> to vector<2x128xf32>
    %11 = vector.broadcast %4 : vector<1x128xf32> to vector<2x128xf32>
    %12 = arith.addf %10, %11 : vector<2x128xf32>
    %cst = arith.constant dense<0.000000e+00> : vector<2x128xf32>
    %13 = tpu.matmul %5, %3, %cst {dimension_numbers = #tpu.dot_dimension_numbers<[1], [0], [0], [1], [0, 0, 1, 1], [], []>} : vector<2x32xbf16>, vector<32x128xbf16>, vector<2x128xf32> -> vector<2x128xf32>
    %14 = arith.addf %12, %13 : vector<2x128xf32>
    %15 = vector.extract_strided_slice %14 {offsets = [0, 0], sizes = [2, 32], strides = [1, 1]} : vector<2x128xf32> to vector<2x32xf32>
    %16 = arith.negf %15 : vector<2x32xf32>
    %17 = math.exp %16 : vector<2x32xf32>
    %cst_11 = arith.constant 1.000000e+00 : f32
    %18 = vector.broadcast %cst_11 : f32 to vector<2x32xf32>
    %19 = arith.addf %18, %17 : vector<2x32xf32>
    %20 = arith.divf %18, %19 : vector<2x32xf32>
    %21 = vector.extract_strided_slice %14 {offsets = [0, 32], sizes = [2, 32], strides = [1, 1]} : vector<2x128xf32> to vector<2x32xf32>
    %22 = arith.negf %21 : vector<2x32xf32>
    %23 = math.exp %22 : vector<2x32xf32>
    %cst_12 = arith.constant 1.000000e+00 : f32
    %24 = vector.broadcast %cst_12 : f32 to vector<2x32xf32>
    %25 = arith.addf %24, %23 : vector<2x32xf32>
    %26 = arith.divf %24, %25 : vector<2x32xf32>
    %27 = vector.extract_strided_slice %14 {offsets = [0, 64], sizes = [2, 32], strides = [1, 1]} : vector<2x128xf32> to vector<2x32xf32>
    %28 = math.tanh %27 : vector<2x32xf32>
    %29 = vector.extract_strided_slice %14 {offsets = [0, 96], sizes = [2, 32], strides = [1, 1]} : vector<2x128xf32> to vector<2x32xf32>
    %30 = arith.negf %29 : vector<2x32xf32>
    %31 = math.exp %30 : vector<2x32xf32>
    %cst_13 = arith.constant 1.000000e+00 : f32
    %32 = vector.broadcast %cst_13 : f32 to vector<2x32xf32>
    %33 = arith.addf %32, %31 : vector<2x32xf32>
    %34 = arith.divf %32, %33 : vector<2x32xf32>
    %35 = arith.mulf %26, %6 : vector<2x32xf32>
    %36 = arith.mulf %20, %28 : vector<2x32xf32>
    %37 = arith.addf %35, %36 : vector<2x32xf32>
    %38 = math.tanh %37 : vector<2x32xf32>
    %39 = arith.mulf %34, %38 : vector<2x32xf32>
    %40 = arith.truncf %39 : vector<2x32xf32> to vector<2x32xbf16>
    %41 = arith.index_cast %c0_i32_8 : i32 to index
    %c0_14 = arith.constant 0 : index
    %c0_15 = arith.constant 0 : index
    %42 = vector.load %arg5[%41, %c0_14, %c0_15] : memref<8x2x32xbf16, #tpu.memory_space<vmem>>, vector<1x2x32xbf16>
    %43 = vector.shape_cast %42 : vector<1x2x32xbf16> to vector<2x32xbf16>
    %44 = vector.shape_cast %40 : vector<2x32xbf16> to vector<1x2x32xbf16>
    tpu.vector_store %arg5[%41, %c0_14, %c0_15], %44 {strides = array<i32>} : memref<8x2x32xbf16, #tpu.memory_space<vmem>>, vector<1x2x32xbf16>,
    %c1_i32 = arith.constant 1 : i32
    %45 = arith.index_cast %c1_i32 : i32 to index
    %c0_16 = arith.constant 0 : index
    %c0_17 = arith.constant 0 : index
    %46 = vector.load %arg2[%45, %c0_16, %c0_17] : memref<8x2x128xbf16, #tpu.memory_space<vmem>>, vector<1x2x128xbf16>
    %47 = vector.shape_cast %46 : vector<1x2x128xbf16> to vector<2x128xbf16>
    %48 = arith.extf %47 : vector<2x128xbf16> to vector<2x128xf32>
    %49 = vector.broadcast %4 : vector<1x128xf32> to vector<2x128xf32>
    %50 = arith.addf %48, %49 : vector<2x128xf32>
    %cst_18 = arith.constant dense<0.000000e+00> : vector<2x128xf32>
    %51 = tpu.matmul %40, %3, %cst_18 {dimension_numbers = #tpu.dot_dimension_numbers<[1], [0], [0], [1], [0, 0, 1, 1], [], []>} : vector<2x32xbf16>, vector<32x128xbf16>, vector<2x128xf32> -> vector<2x128xf32>
    %52 = arith.addf %50, %51 : vector<2x128xf32>
    %53 = vector.extract_strided_slice %52 {offsets = [0, 0], sizes = [2, 32], strides = [1, 1]} : vector<2x128xf32> to vector<2x32xf32>
    %54 = arith.negf %53 : vector<2x32xf32>
    %55 = math.exp %54 : vector<2x32xf32>
    %cst_19 = arith.constant 1.000000e+00 : f32
    %56 = vector.broadcast %cst_19 : f32 to vector<2x32xf32>
    %57 = arith.addf %56, %55 : vector<2x32xf32>
    %58 = arith.divf %56, %57 : vector<2x32xf32>
    %59 = vector.extract_strided_slice %52 {offsets = [0, 32], sizes = [2, 32], strides = [1, 1]} : vector<2x128xf32> to vector<2x32xf32>
    %60 = arith.negf %59 : vector<2x32xf32>
    %61 = math.exp %60 : vector<2x32xf32>
    %cst_20 = arith.constant 1.000000e+00 : f32
    %62 = vector.broadcast %cst_20 : f32 to vector<2x32xf32>
    %63 = arith.addf %62, %61 : vector<2x32xf32>
    %64 = arith.divf %62, %63 : vector<2x32xf32>
    %65 = vector.extract_strided_slice %52 {offsets = [0, 64], sizes = [2, 32], strides = [1, 1]} : vector<2x128xf32> to vector<2x32xf32>
    %66 = math.tanh %65 : vector<2x32xf32>
    %67 = vector.extract_strided_slice %52 {offsets = [0, 96], sizes = [2, 32], strides = [1, 1]} : vector<2x128xf32> to vector<2x32xf32>
    %68 = arith.negf %67 : vector<2x32xf32>
    %69 = math.exp %68 : vector<2x32xf32>
    %cst_21 = arith.constant 1.000000e+00 : f32
    %70 = vector.broadcast %cst_21 : f32 to vector<2x32xf32>
    %71 = arith.addf %70, %69 : vector<2x32xf32>
    %72 = arith.divf %70, %71 : vector<2x32xf32>
    %73 = arith.mulf %64, %37 : vector<2x32xf32>
    %74 = arith.mulf %58, %66 : vector<2x32xf32>
    %75 = arith.addf %73, %74 : vector<2x32xf32>
    %76 = math.tanh %75 : vector<2x32xf32>
    %77 = arith.mulf %72, %76 : vector<2x32xf32>
    %78 = arith.truncf %77 : vector<2x32xf32> to vector<2x32xbf16>
    %79 = arith.index_cast %c1_i32 : i32 to index
    %c0_22 = arith.constant 0 : index
    %c0_23 = arith.constant 0 : index
    %80 = vector.load %arg5[%79, %c0_22, %c0_23] : memref<8x2x32xbf16, #tpu.memory_space<vmem>>, vector<1x2x32xbf16>
    %81 = vector.shape_cast %80 : vector<1x2x32xbf16> to vector<2x32xbf16>
    %82 = vector.shape_cast %78 : vector<2x32xbf16> to vector<1x2x32xbf16>
    tpu.vector_store %arg5[%79, %c0_22, %c0_23], %82 {strides = array<i32>} : memref<8x2x32xbf16, #tpu.memory_space<vmem>>, vector<1x2x32xbf16>,
    %c2_i32 = arith.constant 2 : i32
    %83 = arith.index_cast %c2_i32 : i32 to index
    %c0_24 = arith.constant 0 : index
    %c0_25 = arith.constant 0 : index
    %84 = vector.load %arg2[%83, %c0_24, %c0_25] : memref<8x2x128xbf16, #tpu.memory_space<vmem>>, vector<1x2x128xbf16>
    %85 = vector.shape_cast %84 : vector<1x2x128xbf16> to vector<2x128xbf16>
    %86 = arith.extf %85 : vector<2x128xbf16> to vector<2x128xf32>
    %87 = vector.broadcast %4 : vector<1x128xf32> to vector<2x128xf32>
    %88 = arith.addf %86, %87 : vector<2x128xf32>
    %cst_26 = arith.constant dense<0.000000e+00> : vector<2x128xf32>
    %89 = tpu.matmul %78, %3, %cst_26 {dimension_numbers = #tpu.dot_dimension_numbers<[1], [0], [0], [1], [0, 0, 1, 1], [], []>} : vector<2x32xbf16>, vector<32x128xbf16>, vector<2x128xf32> -> vector<2x128xf32>
    %90 = arith.addf %88, %89 : vector<2x128xf32>
    %91 = vector.extract_strided_slice %90 {offsets = [0, 0], sizes = [2, 32], strides = [1, 1]} : vector<2x128xf32> to vector<2x32xf32>
    %92 = arith.negf %91 : vector<2x32xf32>
    %93 = math.exp %92 : vector<2x32xf32>
    %cst_27 = arith.constant 1.000000e+00 : f32
    %94 = vector.broadcast %cst_27 : f32 to vector<2x32xf32>
    %95 = arith.addf %94, %93 : vector<2x32xf32>
    %96 = arith.divf %94, %95 : vector<2x32xf32>
    %97 = vector.extract_strided_slice %90 {offsets = [0, 32], sizes = [2, 32], strides = [1, 1]} : vector<2x128xf32> to vector<2x32xf32>
    %98 = arith.negf %97 : vector<2x32xf32>
    %99 = math.exp %98 : vector<2x32xf32>
    %cst_28 = arith.constant 1.000000e+00 : f32
    %100 = vector.broadcast %cst_28 : f32 to vector<2x32xf32>
    %101 = arith.addf %100, %99 : vector<2x32xf32>
    %102 = arith.divf %100, %101 : vector<2x32xf32>
    %103 = vector.extract_strided_slice %90 {offsets = [0, 64], sizes = [2, 32], strides = [1, 1]} : vector<2x128xf32> to vector<2x32xf32>
    %104 = math.tanh %103 : vector<2x32xf32>
    %105 = vector.extract_strided_slice %90 {offsets = [0, 96], sizes = [2, 32], strides = [1, 1]} : vector<2x128xf32> to vector<2x32xf32>
    %106 = arith.negf %105 : vector<2x32xf32>
    %107 = math.exp %106 : vector<2x32xf32>
    %cst_29 = arith.constant 1.000000e+00 : f32
    %108 = vector.broadcast %cst_29 : f32 to vector<2x32xf32>
    %109 = arith.addf %108, %107 : vector<2x32xf32>
    %110 = arith.divf %108, %109 : vector<2x32xf32>
    %111 = arith.mulf %102, %75 : vector<2x32xf32>
    %112 = arith.mulf %96, %104 : vector<2x32xf32>
    %113 = arith.addf %111, %112 : vector<2x32xf32>
    %114 = math.tanh %113 : vector<2x32xf32>
    %115 = arith.mulf %110, %114 : vector<2x32xf32>
    %116 = arith.truncf %115 : vector<2x32xf32> to vector<2x32xbf16>
    %117 = arith.index_cast %c2_i32 : i32 to index
    %c0_30 = arith.constant 0 : index
    %c0_31 = arith.constant 0 : index
    %118 = vector.load %arg5[%117, %c0_30, %c0_31] : memref<8x2x32xbf16, #tpu.memory_space<vmem>>, vector<1x2x32xbf16>
    %119 = vector.shape_cast %118 : vector<1x2x32xbf16> to vector<2x32xbf16>
    %120 = vector.shape_cast %116 : vector<2x32xbf16> to vector<1x2x32xbf16>
    tpu.vector_store %arg5[%117, %c0_30, %c0_31], %120 {strides = array<i32>} : memref<8x2x32xbf16, #tpu.memory_space<vmem>>, vector<1x2x32xbf16>,
    %c3_i32 = arith.constant 3 : i32
    %121 = arith.index_cast %c3_i32 : i32 to index
    %c0_32 = arith.constant 0 : index
    %c0_33 = arith.constant 0 : index
    %122 = vector.load %arg2[%121, %c0_32, %c0_33] : memref<8x2x128xbf16, #tpu.memory_space<vmem>>, vector<1x2x128xbf16>
    %123 = vector.shape_cast %122 : vector<1x2x128xbf16> to vector<2x128xbf16>
    %124 = arith.extf %123 : vector<2x128xbf16> to vector<2x128xf32>
    %125 = vector.broadcast %4 : vector<1x128xf32> to vector<2x128xf32>
    %126 = arith.addf %124, %125 : vector<2x128xf32>
    %cst_34 = arith.constant dense<0.000000e+00> : vector<2x128xf32>
    %127 = tpu.matmul %116, %3, %cst_34 {dimension_numbers = #tpu.dot_dimension_numbers<[1], [0], [0], [1], [0, 0, 1, 1], [], []>} : vector<2x32xbf16>, vector<32x128xbf16>, vector<2x128xf32> -> vector<2x128xf32>
    %128 = arith.addf %126, %127 : vector<2x128xf32>
    %129 = vector.extract_strided_slice %128 {offsets = [0, 0], sizes = [2, 32], strides = [1, 1]} : vector<2x128xf32> to vector<2x32xf32>
    %130 = arith.negf %129 : vector<2x32xf32>
    %131 = math.exp %130 : vector<2x32xf32>
    %cst_35 = arith.constant 1.000000e+00 : f32
    %132 = vector.broadcast %cst_35 : f32 to vector<2x32xf32>
    %133 = arith.addf %132, %131 : vector<2x32xf32>
    %134 = arith.divf %132, %133 : vector<2x32xf32>
    %135 = vector.extract_strided_slice %128 {offsets = [0, 32], sizes = [2, 32], strides = [1, 1]} : vector<2x128xf32> to vector<2x32xf32>
    %136 = arith.negf %135 : vector<2x32xf32>
    %137 = math.exp %136 : vector<2x32xf32>
    %cst_36 = arith.constant 1.000000e+00 : f32
    %138 = vector.broadcast %cst_36 : f32 to vector<2x32xf32>
    %139 = arith.addf %138, %137 : vector<2x32xf32>
    %140 = arith.divf %138, %139 : vector<2x32xf32>
    %141 = vector.extract_strided_slice %128 {offsets = [0, 64], sizes = [2, 32], strides = [1, 1]} : vector<2x128xf32> to vector<2x32xf32>
    %142 = math.tanh %141 : vector<2x32xf32>
    %143 = vector.extract_strided_slice %128 {offsets = [0, 96], sizes = [2, 32], strides = [1, 1]} : vector<2x128xf32> to vector<2x32xf32>
    %144 = arith.negf %143 : vector<2x32xf32>
    %145 = math.exp %144 : vector<2x32xf32>
    %cst_37 = arith.constant 1.000000e+00 : f32
    %146 = vector.broadcast %cst_37 : f32 to vector<2x32xf32>
    %147 = arith.addf %146, %145 : vector<2x32xf32>
    %148 = arith.divf %146, %147 : vector<2x32xf32>
    %149 = arith.mulf %140, %113 : vector<2x32xf32>
    %150 = arith.mulf %134, %142 : vector<2x32xf32>
    %151 = arith.addf %149, %150 : vector<2x32xf32>
    %152 = math.tanh %151 : vector<2x32xf32>
    %153 = arith.mulf %148, %152 : vector<2x32xf32>
    %154 = arith.truncf %153 : vector<2x32xf32> to vector<2x32xbf16>
    %155 = arith.index_cast %c3_i32 : i32 to index
    %c0_38 = arith.constant 0 : index
    %c0_39 = arith.constant 0 : index
    %156 = vector.load %arg5[%155, %c0_38, %c0_39] : memref<8x2x32xbf16, #tpu.memory_space<vmem>>, vector<1x2x32xbf16>
    %157 = vector.shape_cast %156 : vector<1x2x32xbf16> to vector<2x32xbf16>
    %158 = vector.shape_cast %154 : vector<2x32xbf16> to vector<1x2x32xbf16>
    tpu.vector_store %arg5[%155, %c0_38, %c0_39], %158 {strides = array<i32>} : memref<8x2x32xbf16, #tpu.memory_space<vmem>>, vector<1x2x32xbf16>,
    %c4_i32 = arith.constant 4 : i32
    %159 = arith.index_cast %c4_i32 : i32 to index
    %c0_40 = arith.constant 0 : index
    %c0_41 = arith.constant 0 : index
    %160 = vector.load %arg2[%159, %c0_40, %c0_41] : memref<8x2x128xbf16, #tpu.memory_space<vmem>>, vector<1x2x128xbf16>
    %161 = vector.shape_cast %160 : vector<1x2x128xbf16> to vector<2x128xbf16>
    %162 = arith.extf %161 : vector<2x128xbf16> to vector<2x128xf32>
    %163 = vector.broadcast %4 : vector<1x128xf32> to vector<2x128xf32>
    %164 = arith.addf %162, %163 : vector<2x128xf32>
    %cst_42 = arith.constant dense<0.000000e+00> : vector<2x128xf32>
    %165 = tpu.matmul %154, %3, %cst_42 {dimension_numbers = #tpu.dot_dimension_numbers<[1], [0], [0], [1], [0, 0, 1, 1], [], []>} : vector<2x32xbf16>, vector<32x128xbf16>, vector<2x128xf32> -> vector<2x128xf32>
    %166 = arith.addf %164, %165 : vector<2x128xf32>
    %167 = vector.extract_strided_slice %166 {offsets = [0, 0], sizes = [2, 32], strides = [1, 1]} : vector<2x128xf32> to vector<2x32xf32>
    %168 = arith.negf %167 : vector<2x32xf32>
    %169 = math.exp %168 : vector<2x32xf32>
    %cst_43 = arith.constant 1.000000e+00 : f32
    %170 = vector.broadcast %cst_43 : f32 to vector<2x32xf32>
    %171 = arith.addf %170, %169 : vector<2x32xf32>
    %172 = arith.divf %170, %171 : vector<2x32xf32>
    %173 = vector.extract_strided_slice %166 {offsets = [0, 32], sizes = [2, 32], strides = [1, 1]} : vector<2x128xf32> to vector<2x32xf32>
    %174 = arith.negf %173 : vector<2x32xf32>
    %175 = math.exp %174 : vector<2x32xf32>
    %cst_44 = arith.constant 1.000000e+00 : f32
    %176 = vector.broadcast %cst_44 : f32 to vector<2x32xf32>
    %177 = arith.addf %176, %175 : vector<2x32xf32>
    %178 = arith.divf %176, %177 : vector<2x32xf32>
    %179 = vector.extract_strided_slice %166 {offsets = [0, 64], sizes = [2, 32], strides = [1, 1]} : vector<2x128xf32> to vector<2x32xf32>
    %180 = math.tanh %179 : vector<2x32xf32>
    %181 = vector.extract_strided_slice %166 {offsets = [0, 96], sizes = [2, 32], strides = [1, 1]} : vector<2x128xf32> to vector<2x32xf32>
    %182 = arith.negf %181 : vector<2x32xf32>
    %183 = math.exp %182 : vector<2x32xf32>
    %cst_45 = arith.constant 1.000000e+00 : f32
    %184 = vector.broadcast %cst_45 : f32 to vector<2x32xf32>
    %185 = arith.addf %184, %183 : vector<2x32xf32>
    %186 = arith.divf %184, %185 : vector<2x32xf32>
    %187 = arith.mulf %178, %151 : vector<2x32xf32>
    %188 = arith.mulf %172, %180 : vector<2x32xf32>
    %189 = arith.addf %187, %188 : vector<2x32xf32>
    %190 = math.tanh %189 : vector<2x32xf32>
    %191 = arith.mulf %186, %190 : vector<2x32xf32>
    %192 = arith.truncf %191 : vector<2x32xf32> to vector<2x32xbf16>
    %193 = arith.index_cast %c4_i32 : i32 to index
    %c0_46 = arith.constant 0 : index
    %c0_47 = arith.constant 0 : index
    %194 = vector.load %arg5[%193, %c0_46, %c0_47] : memref<8x2x32xbf16, #tpu.memory_space<vmem>>, vector<1x2x32xbf16>
    %195 = vector.shape_cast %194 : vector<1x2x32xbf16> to vector<2x32xbf16>
    %196 = vector.shape_cast %192 : vector<2x32xbf16> to vector<1x2x32xbf16>
    tpu.vector_store %arg5[%193, %c0_46, %c0_47], %196 {strides = array<i32>} : memref<8x2x32xbf16, #tpu.memory_space<vmem>>, vector<1x2x32xbf16>,
    %c5_i32 = arith.constant 5 : i32
    %197 = arith.index_cast %c5_i32 : i32 to index
    %c0_48 = arith.constant 0 : index
    %c0_49 = arith.constant 0 : index
    %198 = vector.load %arg2[%197, %c0_48, %c0_49] : memref<8x2x128xbf16, #tpu.memory_space<vmem>>, vector<1x2x128xbf16>
    %199 = vector.shape_cast %198 : vector<1x2x128xbf16> to vector<2x128xbf16>
    %200 = arith.extf %199 : vector<2x128xbf16> to vector<2x128xf32>
    %201 = vector.broadcast %4 : vector<1x128xf32> to vector<2x128xf32>
    %202 = arith.addf %200, %201 : vector<2x128xf32>
    %cst_50 = arith.constant dense<0.000000e+00> : vector<2x128xf32>
    %203 = tpu.matmul %192, %3, %cst_50 {dimension_numbers = #tpu.dot_dimension_numbers<[1], [0], [0], [1], [0, 0, 1, 1], [], []>} : vector<2x32xbf16>, vector<32x128xbf16>, vector<2x128xf32> -> vector<2x128xf32>
    %204 = arith.addf %202, %203 : vector<2x128xf32>
    %205 = vector.extract_strided_slice %204 {offsets = [0, 0], sizes = [2, 32], strides = [1, 1]} : vector<2x128xf32> to vector<2x32xf32>
    %206 = arith.negf %205 : vector<2x32xf32>
    %207 = math.exp %206 : vector<2x32xf32>
    %cst_51 = arith.constant 1.000000e+00 : f32
    %208 = vector.broadcast %cst_51 : f32 to vector<2x32xf32>
    %209 = arith.addf %208, %207 : vector<2x32xf32>
    %210 = arith.divf %208, %209 : vector<2x32xf32>
    %211 = vector.extract_strided_slice %204 {offsets = [0, 32], sizes = [2, 32], strides = [1, 1]} : vector<2x128xf32> to vector<2x32xf32>
    %212 = arith.negf %211 : vector<2x32xf32>
    %213 = math.exp %212 : vector<2x32xf32>
    %cst_52 = arith.constant 1.000000e+00 : f32
    %214 = vector.broadcast %cst_52 : f32 to vector<2x32xf32>
    %215 = arith.addf %214, %213 : vector<2x32xf32>
    %216 = arith.divf %214, %215 : vector<2x32xf32>
    %217 = vector.extract_strided_slice %204 {offsets = [0, 64], sizes = [2, 32], strides = [1, 1]} : vector<2x128xf32> to vector<2x32xf32>
    %218 = math.tanh %217 : vector<2x32xf32>
    %219 = vector.extract_strided_slice %204 {offsets = [0, 96], sizes = [2, 32], strides = [1, 1]} : vector<2x128xf32> to vector<2x32xf32>
    %220 = arith.negf %219 : vector<2x32xf32>
    %221 = math.exp %220 : vector<2x32xf32>
    %cst_53 = arith.constant 1.000000e+00 : f32
    %222 = vector.broadcast %cst_53 : f32 to vector<2x32xf32>
    %223 = arith.addf %222, %221 : vector<2x32xf32>
    %224 = arith.divf %222, %223 : vector<2x32xf32>
    %225 = arith.mulf %216, %189 : vector<2x32xf32>
    %226 = arith.mulf %210, %218 : vector<2x32xf32>
    %227 = arith.addf %225, %226 : vector<2x32xf32>
    %228 = math.tanh %227 : vector<2x32xf32>
    %229 = arith.mulf %224, %228 : vector<2x32xf32>
    %230 = arith.truncf %229 : vector<2x32xf32> to vector<2x32xbf16>
    %231 = arith.index_cast %c5_i32 : i32 to index
    %c0_54 = arith.constant 0 : index
    %c0_55 = arith.constant 0 : index
    %232 = vector.load %arg5[%231, %c0_54, %c0_55] : memref<8x2x32xbf16, #tpu.memory_space<vmem>>, vector<1x2x32xbf16>
    %233 = vector.shape_cast %232 : vector<1x2x32xbf16> to vector<2x32xbf16>
    %234 = vector.shape_cast %230 : vector<2x32xbf16> to vector<1x2x32xbf16>
    tpu.vector_store %arg5[%231, %c0_54, %c0_55], %234 {strides = array<i32>} : memref<8x2x32xbf16, #tpu.memory_space<vmem>>, vector<1x2x32xbf16>,
    %c6_i32 = arith.constant 6 : i32
    %235 = arith.index_cast %c6_i32 : i32 to index
    %c0_56 = arith.constant 0 : index
    %c0_57 = arith.constant 0 : index
    %236 = vector.load %arg2[%235, %c0_56, %c0_57] : memref<8x2x128xbf16, #tpu.memory_space<vmem>>, vector<1x2x128xbf16>
    %237 = vector.shape_cast %236 : vector<1x2x128xbf16> to vector<2x128xbf16>
    %238 = arith.extf %237 : vector<2x128xbf16> to vector<2x128xf32>
    %239 = vector.broadcast %4 : vector<1x128xf32> to vector<2x128xf32>
    %240 = arith.addf %238, %239 : vector<2x128xf32>
    %cst_58 = arith.constant dense<0.000000e+00> : vector<2x128xf32>
    %241 = tpu.matmul %230, %3, %cst_58 {dimension_numbers = #tpu.dot_dimension_numbers<[1], [0], [0], [1], [0, 0, 1, 1], [], []>} : vector<2x32xbf16>, vector<32x128xbf16>, vector<2x128xf32> -> vector<2x128xf32>
    %242 = arith.addf %240, %241 : vector<2x128xf32>
    %243 = vector.extract_strided_slice %242 {offsets = [0, 0], sizes = [2, 32], strides = [1, 1]} : vector<2x128xf32> to vector<2x32xf32>
    %244 = arith.negf %243 : vector<2x32xf32>
    %245 = math.exp %244 : vector<2x32xf32>
    %cst_59 = arith.constant 1.000000e+00 : f32
    %246 = vector.broadcast %cst_59 : f32 to vector<2x32xf32>
    %247 = arith.addf %246, %245 : vector<2x32xf32>
    %248 = arith.divf %246, %247 : vector<2x32xf32>
    %249 = vector.extract_strided_slice %242 {offsets = [0, 32], sizes = [2, 32], strides = [1, 1]} : vector<2x128xf32> to vector<2x32xf32>
    %250 = arith.negf %249 : vector<2x32xf32>
    %251 = math.exp %250 : vector<2x32xf32>
    %cst_60 = arith.constant 1.000000e+00 : f32
    %252 = vector.broadcast %cst_60 : f32 to vector<2x32xf32>
    %253 = arith.addf %252, %251 : vector<2x32xf32>
    %254 = arith.divf %252, %253 : vector<2x32xf32>
    %255 = vector.extract_strided_slice %242 {offsets = [0, 64], sizes = [2, 32], strides = [1, 1]} : vector<2x128xf32> to vector<2x32xf32>
    %256 = math.tanh %255 : vector<2x32xf32>
    %257 = vector.extract_strided_slice %242 {offsets = [0, 96], sizes = [2, 32], strides = [1, 1]} : vector<2x128xf32> to vector<2x32xf32>
    %258 = arith.negf %257 : vector<2x32xf32>
    %259 = math.exp %258 : vector<2x32xf32>
    %cst_61 = arith.constant 1.000000e+00 : f32
    %260 = vector.broadcast %cst_61 : f32 to vector<2x32xf32>
    %261 = arith.addf %260, %259 : vector<2x32xf32>
    %262 = arith.divf %260, %261 : vector<2x32xf32>
    %263 = arith.mulf %254, %227 : vector<2x32xf32>
    %264 = arith.mulf %248, %256 : vector<2x32xf32>
    %265 = arith.addf %263, %264 : vector<2x32xf32>
    %266 = math.tanh %265 : vector<2x32xf32>
    %267 = arith.mulf %262, %266 : vector<2x32xf32>
    %268 = arith.truncf %267 : vector<2x32xf32> to vector<2x32xbf16>
    %269 = arith.index_cast %c6_i32 : i32 to index
    %c0_62 = arith.constant 0 : index
    %c0_63 = arith.constant 0 : index
    %270 = vector.load %arg5[%269, %c0_62, %c0_63] : memref<8x2x32xbf16, #tpu.memory_space<vmem>>, vector<1x2x32xbf16>
    %271 = vector.shape_cast %270 : vector<1x2x32xbf16> to vector<2x32xbf16>
    %272 = vector.shape_cast %268 : vector<2x32xbf16> to vector<1x2x32xbf16>
    tpu.vector_store %arg5[%269, %c0_62, %c0_63], %272 {strides = array<i32>} : memref<8x2x32xbf16, #tpu.memory_space<vmem>>, vector<1x2x32xbf16>,
    %c7_i32 = arith.constant 7 : i32
    %273 = arith.index_cast %c7_i32 : i32 to index
    %c0_64 = arith.constant 0 : index
    %c0_65 = arith.constant 0 : index
    %274 = vector.load %arg2[%273, %c0_64, %c0_65] : memref<8x2x128xbf16, #tpu.memory_space<vmem>>, vector<1x2x128xbf16>
    %275 = vector.shape_cast %274 : vector<1x2x128xbf16> to vector<2x128xbf16>
    %276 = arith.extf %275 : vector<2x128xbf16> to vector<2x128xf32>
    %277 = vector.broadcast %4 : vector<1x128xf32> to vector<2x128xf32>
    %278 = arith.addf %276, %277 : vector<2x128xf32>
    %cst_66 = arith.constant dense<0.000000e+00> : vector<2x128xf32>
    %279 = tpu.matmul %268, %3, %cst_66 {dimension_numbers = #tpu.dot_dimension_numbers<[1], [0], [0], [1], [0, 0, 1, 1], [], []>} : vector<2x32xbf16>, vector<32x128xbf16>, vector<2x128xf32> -> vector<2x128xf32>
    %280 = arith.addf %278, %279 : vector<2x128xf32>
    %281 = vector.extract_strided_slice %280 {offsets = [0, 0], sizes = [2, 32], strides = [1, 1]} : vector<2x128xf32> to vector<2x32xf32>
    %282 = arith.negf %281 : vector<2x32xf32>
    %283 = math.exp %282 : vector<2x32xf32>
    %cst_67 = arith.constant 1.000000e+00 : f32
    %284 = vector.broadcast %cst_67 : f32 to vector<2x32xf32>
    %285 = arith.addf %284, %283 : vector<2x32xf32>
    %286 = arith.divf %284, %285 : vector<2x32xf32>
    %287 = vector.extract_strided_slice %280 {offsets = [0, 32], sizes = [2, 32], strides = [1, 1]} : vector<2x128xf32> to vector<2x32xf32>
    %288 = arith.negf %287 : vector<2x32xf32>
    %289 = math.exp %288 : vector<2x32xf32>
    %cst_68 = arith.constant 1.000000e+00 : f32
    %290 = vector.broadcast %cst_68 : f32 to vector<2x32xf32>
    %291 = arith.addf %290, %289 : vector<2x32xf32>
    %292 = arith.divf %290, %291 : vector<2x32xf32>
    %293 = vector.extract_strided_slice %280 {offsets = [0, 64], sizes = [2, 32], strides = [1, 1]} : vector<2x128xf32> to vector<2x32xf32>
    %294 = math.tanh %293 : vector<2x32xf32>
    %295 = vector.extract_strided_slice %280 {offsets = [0, 96], sizes = [2, 32], strides = [1, 1]} : vector<2x128xf32> to vector<2x32xf32>
    %296 = arith.negf %295 : vector<2x32xf32>
    %297 = math.exp %296 : vector<2x32xf32>
    %cst_69 = arith.constant 1.000000e+00 : f32
    %298 = vector.broadcast %cst_69 : f32 to vector<2x32xf32>
    %299 = arith.addf %298, %297 : vector<2x32xf32>
    %300 = arith.divf %298, %299 : vector<2x32xf32>
    %301 = arith.mulf %292, %265 : vector<2x32xf32>
    %302 = arith.mulf %286, %294 : vector<2x32xf32>
    %303 = arith.addf %301, %302 : vector<2x32xf32>
    %304 = math.tanh %303 : vector<2x32xf32>
    %305 = arith.mulf %300, %304 : vector<2x32xf32>
    %306 = arith.truncf %305 : vector<2x32xf32> to vector<2x32xbf16>
    %307 = arith.index_cast %c7_i32 : i32 to index
    %c0_70 = arith.constant 0 : index
    %c0_71 = arith.constant 0 : index
    %308 = vector.load %arg5[%307, %c0_70, %c0_71] : memref<8x2x32xbf16, #tpu.memory_space<vmem>>, vector<1x2x32xbf16>
    %309 = vector.shape_cast %308 : vector<1x2x32xbf16> to vector<2x32xbf16>
    %310 = vector.shape_cast %306 : vector<2x32xbf16> to vector<1x2x32xbf16>
    tpu.vector_store %arg5[%307, %c0_70, %c0_71], %310 {strides = array<i32>} : memref<8x2x32xbf16, #tpu.memory_space<vmem>>, vector<1x2x32xbf16>,
    %c8_i32 = arith.constant 8 : i32
    %c0_72 = arith.constant 0 : index
    %c0_73 = arith.constant 0 : index
    %311 = vector.load %arg6[%c0_72, %c0_73] : memref<2x32xbf16, #tpu.memory_space<vmem>>, vector<2x32xbf16>
    tpu.vector_store %arg6[%c0_72, %c0_73], %306 {strides = array<i32>} : memref<2x32xbf16, #tpu.memory_space<vmem>>, vector<2x32xbf16>,
    %c0_74 = arith.constant 0 : index
    %c0_75 = arith.constant 0 : index
    %312 = vector.load %arg7[%c0_74, %c0_75] : memref<2x32xf32, #tpu.memory_space<vmem>>, vector<2x32xf32>
    tpu.vector_store %arg7[%c0_74, %c0_75], %303 {strides = array<i32>} : memref<2x32xf32, #tpu.memory_space<vmem>>, vector<2x32xf32>,
    return
  }
  func.func @transform_0(%arg0: i32, %arg1: i32) -> (i32, i32, i32) {
    %c0_i32 = arith.constant 0 : i32
    %c0_i32_0 = arith.constant 0 : i32
    return %arg1, %arg0, %c0_i32 : i32, i32, i32
  }
  func.func @transform_1(%arg0: i32, %arg1: i32) -> (i32, i32) {
    %c0_i32 = arith.constant 0 : i32
    %c0_i32_0 = arith.constant 0 : i32
    %c0_i32_1 = arith.constant 0 : i32
    return %c0_i32, %c0_i32_0 : i32, i32
  }
  func.func @transform_2(%arg0: i32, %arg1: i32) -> (i32, i32) {
    %c0_i32 = arith.constant 0 : i32
    %c0_i32_0 = arith.constant 0 : i32
    %c0_i32_1 = arith.constant 0 : i32
    return %c0_i32, %c0_i32_0 : i32, i32
  }
  func.func @transform_3(%arg0: i32, %arg1: i32) -> (i32, i32, i32) {
    %c0_i32 = arith.constant 0 : i32
    %c0_i32_0 = arith.constant 0 : i32
    return %arg1, %arg0, %c0_i32 : i32, i32, i32
  }
}

</mosaic_0001>

<bundles_post_ra>
// kernel: lstm_block_forward.3
= control target key start
LH: loop header
LB: loop body
LE: loop exit
PB: predicated region body
PF: predicated region fallthrough
CT: control target
= control target key end

     0   :  { %vm19_vm0 = vcmask 253952   ;;  %v1031_v0 = vmov 0.0   ;;  %vm1032_vm1 = vmmov 0   ;;  %v1033_v2 = vmov 0   ;;  %s1034_s19 = smov 64   ;;  %s1035_s20 = smov 32   ;;  %s1263_s1 = inlined_call_operand.vmem [shape: bf16[32,128], index: 1, kind: input, shape index: {}]   ;;  %s1264_s0 = inlined_call_operand.vmem [shape: bf16[8,2,128], index: 0, kind: input, shape index: {}]   ;;  %s1265_s2 = inlined_call_operand.vmem [shape: f32[1,128], index: 2, kind: input, shape index: {}]   ;;  %s1266_s3 = inlined_call_operand.vmem [shape: bf16[8,2,32], index: 3, kind: output, shape index: {}]  }
   0x1   :  { %893 = vmatprep.subr.bf16.mxu0 %v1031_v0  ;;  %v1063_v1 = vld [vmem:[%s1263_s1] sm:$0xff]   ;;  %897 = vmatprep.mubr.msk.bf16.mxu0 %vm1032_vm1, %v1031_v0  ;;  %20 = vst.msk [vmem:[#allocation2] sm:$0x1] %vm19_vm0, %v1033_v2  ;;  %v1075_v3 = vld [vmem:[%s1263_s1 + $0x8] sm:$0xff]   ;;  %vm51_vm2 = vcmask 261120   ;;  %vm21_vm3 = vcmask 254976  }
   0x2   :  { %901 = vmatprep.subr.bf16.mxu1 %v1031_v0  ;;  %905 = vmatprep.mubr.msk.bf16.mxu1 %vm1032_vm1, %v1031_v0  ;;  %22 = vst.msk [vmem:[#allocation3] sm:$0x3] %vm21_vm3, %v1031_v0  ;;  %v30_v5 = vld [vmem:[%s1264_s0] sm:$0x1]  ;;  %v841_v31 = vld [vmem:[%s1264_s0 + $0x1] sm:$0x1] }
   0x3   :  { %894 = vmatpush3.bf16.msra.mxu0 %v1063_v1  ;;  %902 = vmatpush3.bf16.msra.mxu1 %v1063_v1  ;;  %v31_v6 = vunpack.c.l.bf16 %v30_v5  ;;  %v1099_v7 = vld [vmem:[%s1265_s2] ss:$0 sm:$0xff]  ;;  %v154_v32 = vunpack.c.l.bf16 %v841_v31  ;;  %v845_v54 = vld [vmem:[%s1264_s0 + $0x2] sm:$0x1]  ;;  %s1038_s8 = smov 96  }
   0x4   :  { %895 = vmatprep.subr.bf16.mxu0 %v1031_v0  ;;  %903 = vmatprep.subr.bf16.mxu1 %v1031_v0  ;;  %v249_v55 = vunpack.c.l.bf16 %v845_v54 }
   0x5   :  { %v38_v8 = vadd.f32 %v1099_v7, %v31_v6  ;;  %v155_v33 = vadd.f32 %v1099_v7, %v154_v32 }
   0x6   :  { %v250_v56 = vadd.f32 %v1099_v7, %v249_v55 }
   0x7   :  { %896 = vmatpush3.bf16.msra.mxu0 %v1075_v3  ;;  %904 = vmatpush3.bf16.msra.mxu1 %v1075_v3 }
   0x8   :  { %v28_v4 = vld [vmem:[#allocation2] sm:$0x1]  ;;  %909 = vmatprep.subr.bf16.mxu0 %v1031_v0  ;;  %917 = vmatprep.subr.bf16.mxu1 %v1031_v0 }
   0x9   :  { %v840_v15 = vld.sshfl [vmem:[#allocation3] sm:$0x3 pattern:$0x76325410] }
   0xa   :  { %898 = vmatmul.mubr.msk.bf16.vlgmr.msra.gmra.mrb[0].mxu0 %vm51_vm2, %v28_v4 }
   0xb   :  { %910 = vmatpush3.bf16.msra.mxu0 %v1063_v1  ;;  %913 = vmatprep.mubr.msk.bf16.mxu0 %vm1032_vm1, %v1031_v0 }
   0xc   :  { %911 = vmatprep.subr.bf16.mxu0 %v1031_v0 }
   0xf   :  { %912 = vmatpush3.bf16.msra.mxu0 %v1075_v3 }
  0x10   :  { %925 = vmatprep.subr.bf16.mxu0 %v1031_v0 }
  0xdd   :  { %v89_v9 = vpop.f32.mrb[0].mxu0 }
  0xde   :  { %v95_v10 = vadd.f32 %v89_v9, %v38_v8  ;;  %v899_v11 = vpop.f32.mrb[1].mxu0 }
  0xdf   :  { %v92_v12 = vpop.f32.mrb[2].mxu0 }
  0xe0   :  { %967 = vtanh.f32 %v95_v10  ;;  %v900_v13 = vpop.f32.mrb[3].mxu0  ;;  %v839_v16 = vmul.f32 -1.442695, %v95_v10 }
  0xe2   :  { %969 = vpow2.f32 %v839_v16 }
  0xea   :  { %v968_v14 = vpop.eup %967 }
  0xeb   :  { %116 = vrot.lane.b32.xlu0 %v968_v14, %s1034_s19 }
  0xec   :  { %v970_v17 = vpop.eup %969 }
  0xed   :  { %v99_v18 = vadd.f32 1.0, %v970_v17  ;;  %v849_v17 = vld [vmem:[%s1264_s0 + $0x3] sm:$0x1] }
  0xef   :  { %111 = vrot.lane.b32.xlu0 %v840_v15, %s1035_s20  ;;  %971 = vrcp.f32 %v99_v18  ;;  %v344_v18 = vunpack.c.l.bf16 %v849_v17 }
  0xf9   :  { %v972_v19 = vpop.eup %971 }
 0x15d   :  { %v117_v20 = vpop.permute.xlu0 %116 }
 0x15e   :  { %v119_v21 = vmul.f32 %v972_v19, %v117_v20 }
 0x160   :  { %121 = vrot.lane.b32.xlu1 %v119_v21, %s1035_s20 }
 0x161   :  { %v112_v22 = vpop.permute.xlu0 %111 }
 0x162   :  { %v114_v23 = vmul.f32 %v972_v19, %v112_v22 }
 0x1d2   :  { %v122_v24 = vpop.permute.xlu1 %121 }
 0x1d3   :  { %v124_v25 = vadd.f32 %v122_v24, %v114_v23 }
 0x1d5   :  { %973 = vtanh.f32 %v124_v25 }
 0x1df   :  { %v974_v26 = vpop.eup %973 }
 0x1e0   :  { %127 = vrot.lane.b32.xlu1 %v974_v26, %s1034_s19 }
 0x252   :  { %v128_v27 = vpop.permute.xlu1 %127 }
 0x253   :  { %v130_v28 = vmul.f32 %v972_v19, %v128_v27  ;;  %v345_v19 = vadd.f32 %v1099_v7, %v344_v18 }
 0x255   :  { %v1106_v29 = vpack.c.bf16 %v130_v28, %v130_v28 }
 0x257   :  { %156 = vrot.lane.b32.xlu0 %v1106_v29, %s1035_s20 }
 0x2c9   :  { %v157_v30 = vpop.permute.xlu0 %156 }
 0x2ca   :  { %906 = vmatmul.mubr.msk.bf16.vlgmr.msra.gmra.mrb[0].mxu1 %vm51_vm2, %v157_v30 }
 0x2cb   :  { %918 = vmatpush3.bf16.msra.mxu1 %v1063_v1  ;;  %921 = vmatprep.mubr.msk.bf16.mxu1 %vm1032_vm1, %v1031_v0 }
 0x2cc   :  { %919 = vmatprep.subr.bf16.mxu1 %v1031_v0 }
 0x2cf   :  { %920 = vmatpush3.bf16.msra.mxu1 %v1075_v3 }
 0x2d0   :  { %933 = vmatprep.subr.bf16.mxu1 %v1031_v0 }
 0x39d   :  { %v195_v34 = vpop.f32.mrb[0].mxu1 }
 0x39e   :  { %v201_v35 = vadd.f32 %v195_v34, %v155_v33  ;;  %v907_v36 = vpop.f32.mrb[1].mxu1 }
 0x39f   :  { %v198_v37 = vpop.f32.mrb[2].mxu1 }
 0x3a0   :  { %975 = vtanh.f32 %v201_v35  ;;  %v908_v38 = vpop.f32.mrb[3].mxu1  ;;  %v843_v40 = vmul.f32 -1.442695, %v201_v35 }
 0x3a2   :  { %977 = vpow2.f32 %v843_v40 }
 0x3aa   :  { %v976_v39 = vpop.eup %975 }
 0x3ab   :  { %211 = vrot.lane.b32.xlu1 %v976_v39, %s1034_s19 }
 0x3ac   :  { %v978_v41 = vpop.eup %977 }
 0x3ad   :  { %v205_v42 = vadd.f32 1.0, %v978_v41  ;;  %v853_v41 = vld [vmem:[%s1264_s0 + $0x4] sm:$0x1] }
 0x3af   :  { %979 = vrcp.f32 %v205_v42  ;;  %v439_v42 = vunpack.c.l.bf16 %v853_v41 }
 0x3b9   :  { %v980_v43 = vpop.eup %979 }
 0x3ba   :  { %v209_v46 = vmul.f32 %v980_v43, %v124_v25 }
 0x41d   :  { %v212_v44 = vpop.permute.xlu1 %211 }
 0x41e   :  { %v214_v45 = vmul.f32 %v980_v43, %v212_v44 }
 0x420   :  { %216 = vrot.lane.b32.xlu0 %v214_v45, %s1035_s20 }
 0x492   :  { %v217_v47 = vpop.permute.xlu0 %216 }
 0x493   :  { %v219_v48 = vadd.f32 %v217_v47, %v209_v46 }
 0x495   :  { %981 = vtanh.f32 %v219_v48 }
 0x49f   :  { %v982_v49 = vpop.eup %981 }
 0x4a0   :  { %222 = vrot.lane.b32.xlu1 %v982_v49, %s1034_s19 }
 0x512   :  { %v223_v50 = vpop.permute.xlu1 %222 }
 0x513   :  { %v225_v51 = vmul.f32 %v980_v43, %v223_v50  ;;  %v440_v43 = vadd.f32 %v1099_v7, %v439_v42 }
 0x515   :  { %v1124_v52 = vpack.c.bf16 %v225_v51, %v225_v51 }
 0x517   :  { %251 = vrot.lane.b32.xlu0 %v1124_v52, %s1035_s20 }
 0x589   :  { %v252_v53 = vpop.permute.xlu0 %251 }
 0x58a   :  { %914 = vmatmul.mubr.msk.bf16.vlgmr.msra.gmra.mrb[4].mxu0 %vm51_vm2, %v252_v53 }
 0x58b   :  { %926 = vmatpush3.bf16.msra.mxu0 %v1063_v1  ;;  %929 = vmatprep.mubr.msk.bf16.mxu0 %vm1032_vm1, %v1031_v0 }
 0x58c   :  { %927 = vmatprep.subr.bf16.mxu0 %v1031_v0 }
 0x58f   :  { %928 = vmatpush3.bf16.msra.mxu0 %v1075_v3 }
 0x590   :  { %941 = vmatprep.subr.bf16.mxu0 %v1031_v0 }
 0x65d   :  { %v290_v57 = vpop.f32.mrb[4].mxu0 }
 0x65e   :  { %v296_v58 = vadd.f32 %v290_v57, %v250_v56  ;;  %v915_v59 = vpop.f32.mrb[5].mxu0 }
 0x65f   :  { %v293_v60 = vpop.f32.mrb[6].mxu0 }
 0x660   :  { %983 = vtanh.f32 %v296_v58  ;;  %v916_v61 = vpop.f32.mrb[7].mxu0  ;;  %v847_v63 = vmul.f32 -1.442695, %v296_v58 }
 0x662   :  { %985 = vpow2.f32 %v847_v63 }
 0x66a   :  { %v984_v62 = vpop.eup %983 }
 0x66b   :  { %306 = vrot.lane.b32.xlu1 %v984_v62, %s1034_s19 }
 0x66c   :  { %v986_v2 = vpop.eup %985 }
 0x66d   :  { %v300_v4 = vadd.f32 1.0, %v986_v2 }
 0x66f   :  { %987 = vrcp.f32 %v300_v4  ;;  %v857_v4 = vld [vmem:[%s1264_s0 + $0x5] sm:$0x1] }
 0x679   :  { %v988_v5 = vpop.eup %987 }
 0x67a   :  { %v304_v9 = vmul.f32 %v988_v5, %v219_v48 }
 0x6dd   :  { %v307_v6 = vpop.permute.xlu1 %306 }
 0x6de   :  { %v309_v8 = vmul.f32 %v988_v5, %v307_v6 }
 0x6e0   :  { %311 = vrot.lane.b32.xlu0 %v309_v8, %s1035_s20 }
 0x752   :  { %v312_v10 = vpop.permute.xlu0 %311 }
 0x753   :  { %v314_v11 = vadd.f32 %v312_v10, %v304_v9 }
 0x755   :  { %989 = vtanh.f32 %v314_v11 }
 0x75f   :  { %v990_v12 = vpop.eup %989 }
 0x760   :  { %317 = vrot.lane.b32.xlu1 %v990_v12, %s1034_s19 }
 0x7d2   :  { %v318_v13 = vpop.permute.xlu1 %317 }
 0x7d3   :  { %v320_v14 = vmul.f32 %v988_v5, %v318_v13  ;;  %v534_v5 = vunpack.c.l.bf16 %v857_v4  ;;  %v1036_v4 = vmov 1966171168  }
 0x7d5   :  { %v1142_v15 = vpack.c.bf16 %v320_v14, %v320_v14  ;;  %v535_v6 = vadd.f32 %v1099_v7, %v534_v5  ;;  %v134_v5 = vunpack.c.l.s4 %v1036_v4 }
 0x7d7   :  { %346 = vrot.lane.b32.xlu0 %v1142_v15, %s1035_s20 }
 0x849   :  { %v347_v16 = vpop.permute.xlu0 %346 }
 0x84a   :  { %922 = vmatmul.mubr.msk.bf16.vlgmr.msra.gmra.mrb[4].mxu1 %vm51_vm2, %v347_v16 }
 0x84b   :  { %934 = vmatpush3.bf16.msra.mxu1 %v1063_v1  ;;  %937 = vmatprep.mubr.msk.bf16.mxu1 %vm1032_vm1, %v1031_v0 }
 0x84c   :  { %935 = vmatprep.subr.bf16.mxu1 %v1031_v0 }
 0x84f   :  { %936 = vmatpush3.bf16.msra.mxu1 %v1075_v3 }
 0x850   :  { %949 = vmatprep.subr.bf16.mxu1 %v1031_v0 }
 0x91d   :  { %v385_v20 = vpop.f32.mrb[4].mxu1 }
 0x91e   :  { %v391_v21 = vadd.f32 %v385_v20, %v345_v19  ;;  %v923_v22 = vpop.f32.mrb[5].mxu1 }
 0x91f   :  { %v388_v23 = vpop.f32.mrb[6].mxu1 }
 0x920   :  { %991 = vtanh.f32 %v391_v21  ;;  %v924_v24 = vpop.f32.mrb[7].mxu1  ;;  %v851_v26 = vmul.f32 -1.442695, %v391_v21 }
 0x922   :  { %993 = vpow2.f32 %v851_v26  ;;  %v861_v26 = vld [vmem:[%s1264_s0 + $0x6] sm:$0x1] }
 0x92a   :  { %v992_v25 = vpop.eup %991 }
 0x92b   :  { %401 = vrot.lane.b32.xlu1 %v992_v25, %s1034_s19 }
 0x92c   :  { %v994_v27 = vpop.eup %993 }
 0x92d   :  { %v395_v28 = vadd.f32 1.0, %v994_v27  ;;  %v629_v27 = vunpack.c.l.bf16 %v861_v26 }
 0x92f   :  { %995 = vrcp.f32 %v395_v28  ;;  %v630_v28 = vadd.f32 %v1099_v7, %v629_v27 }
 0x939   :  { %v996_v30 = vpop.eup %995 }
 0x93a   :  { %v399_v33 = vmul.f32 %v996_v30, %v314_v11 }
 0x99d   :  { %v402_v31 = vpop.permute.xlu1 %401 }
 0x99e   :  { %v404_v32 = vmul.f32 %v996_v30, %v402_v31 }
 0x9a0   :  { %406 = vrot.lane.b32.xlu0 %v404_v32, %s1035_s20 }
 0xa12   :  { %v407_v34 = vpop.permute.xlu0 %406 }
 0xa13   :  { %v409_v35 = vadd.f32 %v407_v34, %v399_v33 }
 0xa15   :  { %997 = vtanh.f32 %v409_v35 }
 0xa1f   :  { %v998_v36 = vpop.eup %997 }
 0xa20   :  { %412 = vrot.lane.b32.xlu1 %v998_v36, %s1034_s19 }
 0xa92   :  { %v413_v37 = vpop.permute.xlu1 %412 }
 0xa93   :  { %v415_v38 = vmul.f32 %v996_v30, %v413_v37 }
 0xa95   :  { %v1160_v39 = vpack.c.bf16 %v415_v38, %v415_v38 }
 0xa97   :  { %441 = vrot.lane.b32.xlu0 %v1160_v39, %s1035_s20 }
 0xb09   :  { %v442_v40 = vpop.permute.xlu0 %441 }
 0xb0a   :  { %930 = vmatmul.mubr.msk.bf16.vlgmr.msra.gmra.mrb[8].mxu0 %vm51_vm2, %v442_v40 }
 0xb0b   :  { %942 = vmatpush3.bf16.msra.mxu0 %v1063_v1  ;;  %945 = vmatprep.mubr.msk.bf16.mxu0 %vm1032_vm1, %v1031_v0 }
 0xb0c   :  { %943 = vmatprep.subr.bf16.mxu0 %v1031_v0 }
 0xb0f   :  { %944 = vmatpush3.bf16.msra.mxu0 %v1075_v3 }
 0xbdd   :  { %v480_v44 = vpop.f32.mrb[8].mxu0 }
 0xbde   :  { %v486_v45 = vadd.f32 %v480_v44, %v440_v43  ;;  %v931_v46 = vpop.f32.mrb[9].mxu0 }
 0xbdf   :  { %v483_v47 = vpop.f32.mrb[10].mxu0 }
 0xbe0   :  { %999 = vtanh.f32 %v486_v45  ;;  %v932_v48 = vpop.f32.mrb[11].mxu0  ;;  %v855_v50 = vmul.f32 -1.442695, %v486_v45 }
 0xbe2   :  { %1001 = vpow2.f32 %v855_v50 }
 0xbea   :  { %v1000_v49 = vpop.eup %999 }
 0xbeb   :  { %496 = vrot.lane.b32.xlu1 %v1000_v49, %s1034_s19 }
 0xbec   :  { %v1002_v51 = vpop.eup %1001 }
 0xbed   :  { %v490_v53 = vadd.f32 1.0, %v1002_v51  ;;  %v865_v51 = vld [vmem:[%s1264_s0 + $0x7] sm:$0x1] }
 0xbef   :  { %1003 = vrcp.f32 %v490_v53  ;;  %v724_v53 = vunpack.c.l.bf16 %v865_v51 }
 0xbf9   :  { %v1004_v54 = vpop.eup %1003 }
 0xbfa   :  { %v494_v57 = vmul.f32 %v1004_v54, %v409_v35 }
 0xc5d   :  { %v497_v55 = vpop.permute.xlu1 %496 }
 0xc5e   :  { %v499_v56 = vmul.f32 %v1004_v54, %v497_v55 }
 0xc60   :  { %501 = vrot.lane.b32.xlu0 %v499_v56, %s1035_s20 }
 0xcd2   :  { %v502_v58 = vpop.permute.xlu0 %501 }
 0xcd3   :  { %v504_v59 = vadd.f32 %v502_v58, %v494_v57 }
 0xcd5   :  { %1005 = vtanh.f32 %v504_v59 }
 0xcdf   :  { %v1006_v60 = vpop.eup %1005 }
 0xce0   :  { %507 = vrot.lane.b32.xlu1 %v1006_v60, %s1034_s19 }
 0xd52   :  { %v508_v61 = vpop.permute.xlu1 %507 }
 0xd53   :  { %v510_v62 = vmul.f32 %v1004_v54, %v508_v61  ;;  %v725_v54 = vadd.f32 %v1099_v7, %v724_v53 }
 0xd55   :  { %v1177_v63 = vpack.c.bf16 %v510_v62, %v510_v62 }
 0xd57   :  { %536 = vrot.lane.b32.xlu0 %v1177_v63, %s1035_s20 }
 0xdc9   :  { %v537_v2 = vpop.permute.xlu0 %536 }
 0xdca   :  { %938 = vmatmul.mubr.msk.bf16.vlgmr.msra.gmra.mrb[8].mxu1 %vm51_vm2, %v537_v2 }
 0xdcb   :  { %950 = vmatpush3.bf16.msra.mxu1 %v1063_v1  ;;  %953 = vmatprep.mubr.msk.bf16.mxu1 %vm1032_vm1, %v1031_v0 }
 0xdcc   :  { %951 = vmatprep.subr.bf16.mxu1 %v1031_v0 }
 0xdcf   :  { %952 = vmatpush3.bf16.msra.mxu1 %v1075_v3 }
 0xe9d   :  { %v575_v8 = vpop.f32.mrb[8].mxu1 }
 0xe9e   :  { %v581_v9 = vadd.f32 %v575_v8, %v535_v6  ;;  %v939_v10 = vpop.f32.mrb[9].mxu1  ;;  %v136_v6 = vlaneseq  ;;  %v135_v8 = vunpack.c.0.s8 %v134_v5 }
 0xe9f   :  { %v578_v11 = vpop.f32.mrb[10].mxu1 }
 0xea0   :  { %1007 = vtanh.f32 %v581_v9  ;;  %v940_v1 = vpop.f32.mrb[11].mxu1  ;;  %v859_v13 = vmul.f32 -1.442695, %v581_v9  ;;  %v137_v9 = vshrl.u32 %v136_v6, 7 }
 0xea2   :  { %1009 = vpow2.f32 %v859_v13  ;;  %v138_v7 = vsub.s32 %v135_v8, %v137_v9 }
 0xea4   :  { %v139_v1 = vrot.slane %v1106_v29, %v138_v7  ;;  %v329_v13 = vrot.slane %v1142_v15, %v138_v7  ;;  %v1037_v29 = vmov 1983009808   ;;  %v234_v27 = vrot.slane %v1124_v52, %v138_v7 }
 0xeaa   :  { %v1008_v12 = vpop.eup %1007 }
 0xeab   :  { %591 = vrot.lane.b32.xlu1 %v1008_v12, %s1034_s19 }
 0xeac   :  { %v1010_v0 = vpop.eup %1009 }
 0xead   :  { %v585_v3 = vadd.f32 1.0, %v1010_v0  ;;  %v146_v0 = vrot.slane %v139_v1, %v138_v7 }
 0xeaf   :  { %1011 = vrcp.f32 %v585_v3  ;;  %v519_v3 = vrot.slane %v1177_v63, %v138_v7 }
 0xeb9   :  { %v1012_v14 = vpop.eup %1011 }
 0xeba   :  { %v589_v18 = vmul.f32 %v1012_v14, %v504_v59 }
 0xf1d   :  { %v592_v16 = vpop.permute.xlu1 %591 }
 0xf1e   :  { %v594_v17 = vmul.f32 %v1012_v14, %v592_v16 }
 0xf20   :  { %596 = vrot.lane.b32.xlu0 %v594_v17, %s1035_s20  ;;  %v526_v17 = vrot.slane %v519_v3, %v138_v7 }
 0xf92   :  { %v597_v19 = vpop.permute.xlu0 %596 }
 0xf93   :  { %v599_v20 = vadd.f32 %v597_v19, %v589_v18  ;;  %v820_v19 = vunpack.c.l.s4 %v1037_v29 }
 0xf95   :  { %1013 = vtanh.f32 %v599_v20 }
 0xf9f   :  { %v1014_v21 = vpop.eup %1013 }
 0xfa0   :  { %602 = vrot.lane.b32.xlu1 %v1014_v21, %s1034_s19 }
0x1012   :  { %v603_v22 = vpop.permute.xlu1 %602 }
0x1013   :  { %v605_v23 = vmul.f32 %v1012_v14, %v603_v22  ;;  %v336_v14 = vrot.slane %v329_v13, %v138_v7 }
0x1015   :  { %v1194_v24 = vpack.c.bf16 %v605_v23, %v605_v23 }
0x1017   :  { %631 = vrot.lane.b32.xlu0 %v1194_v24, %s1035_s20  ;;  %v614_v52 = vrot.slane %v1194_v24, %v138_v7 }
0x1089   :  { %v632_v25 = vpop.permute.xlu0 %631 }
0x108a   :  { %946 = vmatmul.mubr.msk.bf16.vlgmr.msra.gmra.mrb[12].mxu0 %vm51_vm2, %v632_v25 }
0x115d   :  { %v670_v30 = vpop.f32.mrb[12].mxu0 }
0x115e   :  { %v676_v31 = vadd.f32 %v670_v30, %v630_v28  ;;  %v947_v32 = vpop.f32.mrb[13].mxu0 }
0x115f   :  { %v673_v33 = vpop.f32.mrb[14].mxu0 }
0x1160   :  { %1015 = vtanh.f32 %v676_v31  ;;  %v948_v34 = vpop.f32.mrb[15].mxu0  ;;  %v863_v36 = vmul.f32 -1.442695, %v676_v31  ;;  %v424_v31 = vrot.slane %v1160_v39, %v138_v7  ;;  %v241_v33 = vrot.slane %v234_v27, %v138_v7 }
0x1162   :  { %1017 = vpow2.f32 %v863_v36  ;;  %v431_v34 = vrot.slane %v424_v31, %v138_v7 }
0x116a   :  { %v1016_v35 = vpop.eup %1015 }
0x116b   :  { %686 = vrot.lane.b32.xlu1 %v1016_v35, %s1034_s19  ;;  %v621_v35 = vrot.slane %v614_v52, %v138_v7 }
0x116c   :  { %v1018_v37 = vpop.eup %1017 }
0x116d   :  { %v680_v38 = vadd.f32 1.0, %v1018_v37 }
0x116f   :  { %1019 = vrcp.f32 %v680_v38 }
0x1179   :  { %v1020_v40 = vpop.eup %1019 }
0x117a   :  { %v684_v43 = vmul.f32 %v1020_v40, %v599_v20  ;;  %v821_v20 = vunpack.c.0.s8 %v820_v19 }
0x117c   :  { %v824_v21 = vsub.s32 %v821_v20, %v137_v9 }
0x11dd   :  { %v687_v41 = vpop.permute.xlu1 %686 }
0x11de   :  { %v689_v42 = vmul.f32 %v1020_v40, %v687_v41 }
0x11e0   :  { %691 = vrot.lane.b32.xlu0 %v689_v42, %s1035_s20 }
0x1252   :  { %v692_v44 = vpop.permute.xlu0 %691 }
0x1253   :  { %v694_v45 = vadd.f32 %v692_v44, %v684_v43 }
0x1255   :  { %1021 = vtanh.f32 %v694_v45 }
0x125f   :  { %v1022_v46 = vpop.eup %1021 }
0x1260   :  { %697 = vrot.lane.b32.xlu1 %v1022_v46, %s1034_s19 }
0x12d2   :  { %v698_v47 = vpop.permute.xlu1 %697 }
0x12d3   :  { %v700_v48 = vmul.f32 %v1020_v40, %v698_v47 }
0x12d5   :  { %v701_v49 = vpack.c.bf16 %v700_v48, %v700_v48 }
0x12d7   :  { %726 = vrot.lane.b32.xlu0 %v701_v49, %s1035_s20  ;;  %v709_v16 = vrot.slane %v701_v49, %v138_v7 }
0x12d9   :  { %v716_v18 = vrot.slane %v709_v16, %v138_v7 }
0x1349   :  { %v727_v50 = vpop.permute.xlu0 %726 }
0x134a   :  { %954 = vmatmul.mubr.msk.bf16.vlgmr.msra.gmra.mrb[12].mxu1 %vm51_vm2, %v727_v50 }
0x141d   :  { %v765_v55 = vpop.f32.mrb[12].mxu1 }
0x141e   :  { %v771_v56 = vadd.f32 %v765_v55, %v725_v54  ;;  %v955_v57 = vpop.f32.mrb[13].mxu1 }
0x141f   :  { %v768_v58 = vpop.f32.mrb[14].mxu1 }
0x1420   :  { %1023 = vtanh.f32 %v771_v56  ;;  %v956_v59 = vpop.f32.mrb[15].mxu1  ;;  %v867_v61 = vmul.f32 -1.442695, %v771_v56 }
0x1422   :  { %1025 = vpow2.f32 %v867_v61 }
0x142a   :  { %v1024_v60 = vpop.eup %1023 }
0x142b   :  { %781 = vrot.lane.b32.xlu1 %v1024_v60, %s1034_s19 }
0x142c   :  { %v1026_v62 = vpop.eup %1025 }
0x142d   :  { %v775_v2 = vadd.f32 1.0, %v1026_v62 }
0x142f   :  { %1027 = vrcp.f32 %v775_v2 }
0x1439   :  { %v1028_v10 = vpop.eup %1027 }
0x143a   :  { %v779_v15 = vmul.f32 %v1028_v10, %v694_v45 }
0x149d   :  { %v782_v11 = vpop.permute.xlu1 %781 }
0x149e   :  { %v784_v12 = vmul.f32 %v1028_v10, %v782_v11 }
0x14a0   :  { %786 = vrot.lane.b32.xlu0 %v784_v12, %s1035_s20 }
0x14a4   :  { %147 = vrot.lane.b32.xlu0 %v146_v0, %s1035_s20 }
0x14a8   :  { %337 = vrot.lane.b32.xlu0 %v336_v14, %s1035_s20 }
0x14ac   :  { %527 = vrot.lane.b32.xlu0 %v526_v17, %s1035_s20 }
0x14b0   :  { %717 = vrot.lane.b32.xlu0 %v716_v18, %s1035_s20 }
0x1512   :  { %v787_v22 = vpop.permute.xlu0 %786 }
0x1513   :  { %v789_v23 = vadd.f32 %v787_v22, %v779_v15 }
0x1515   :  { %1029 = vtanh.f32 %v789_v23  ;;  %v825_v25 = vrot.slane %v789_v23, %v824_v21 }
0x1516   :  { %v148_v63 = vpop.permute.xlu0 %147 }
0x1517   :  { %151 = vst.msk [vmem:[%s1266_s3] sm:$0x1] %vm19_vm0, %v148_v63  ;;  %826 = vrot.lane.b32.xlu0 %v825_v25, %s1038_s8 }
0x151a   :  { %v338_v26 = vpop.permute.xlu0 %337 }
0x151b   :  { %848 = vst.msk [vmem:[%s1266_s3 + $0x2] sm:$0x1] %vm19_vm0, %v338_v26 }
0x151e   :  { %v528_v28 = vpop.permute.xlu0 %527 }
0x151f   :  { %v1030_v30 = vpop.eup %1029  ;;  %856 = vst.msk [vmem:[%s1266_s3 + $0x4] sm:$0x1] %vm19_vm0, %v528_v28 }
0x1520   :  { %792 = vrot.lane.b32.xlu1 %v1030_v30, %s1034_s19 }
0x1522   :  { %v718_v32 = vpop.permute.xlu0 %717 }
0x1523   :  { %864 = vst.msk [vmem:[%s1266_s3 + $0x6] sm:$0x1] %vm19_vm0, %v718_v32 }
0x1524   :  { %242 = vrot.lane.b32.xlu1 %v241_v33, %s1035_s20 }
0x1528   :  { %432 = vrot.lane.b32.xlu1 %v431_v34, %s1035_s20 }
0x152c   :  { %622 = vrot.lane.b32.xlu1 %v621_v35, %s1035_s20 }
0x1589   :  { %v827_v36 = vpop.permute.xlu0 %826 }
0x158a   :  { %830 = vst.msk [vmem:[#allocation3] sm:$0x3] %vm21_vm3, %v827_v36 }
0x1592   :  { %v793_v39 = vpop.permute.xlu1 %792 }
0x1593   :  { %v795_v37 = vmul.f32 %v1028_v10, %v793_v39 }
0x1595   :  { %v796_v38 = vpack.c.bf16 %v795_v37, %v795_v37 }
0x1596   :  { %v243_v40 = vpop.permute.xlu1 %242 }
0x1597   :  { %v804_v41 = vrot.slane %v796_v38, %v138_v7  ;;  %844 = vst.msk [vmem:[%s1266_s3 + $0x1] sm:$0x1] %vm19_vm0, %v243_v40 }
0x1599   :  { %v811_v24 = vrot.slane %v804_v41, %v138_v7 }
0x159a   :  { %v433_v42 = vpop.permute.xlu1 %432 }
0x159b   :  { %852 = vst.msk [vmem:[%s1266_s3 + $0x3] sm:$0x1] %vm19_vm0, %v433_v42  ;;  %812 = vrot.lane.b32.xlu1 %v811_v24, %s1035_s20 }
0x159e   :  { %v623_v43 = vpop.permute.xlu1 %622 }
0x159f   :  { %860 = vst.msk [vmem:[%s1266_s3 + $0x5] sm:$0x1] %vm19_vm0, %v623_v43 }
0x160d   :  { %v813_v44 = vpop.permute.xlu1 %812 }
0x160e   :  { %868 = vst.msk [vmem:[%s1266_s3 + $0x7] sm:$0x1] %vm19_vm0, %v813_v44  ;;  %817 = vst.msk [vmem:[#allocation2] sm:$0x1] %vm19_vm0, %v813_v44 }

</bundles_post_ra>
